<compile_context>
chip_gen: v7x
topology: tpu7x:2x2x1
jax: 0.10.0
libtpu: 0.0.40
codegen_flags: <defaults>
</compile_context>

<pallas_src>
import math

import jax
import jax.numpy as jnp
from jax.experimental import pallas as pl
from jax.experimental.pallas import tpu as pltpu

_LANE = 128


def _build_pe_table(d_model: int, max_len: int = 512, dtype=jnp.float32) -> jnp.ndarray:
    """Deterministic sinusoidal positional-encoding table, shape (max_len, d_model)."""
    position = jnp.arange(0, max_len, dtype=jnp.float32)[:, None]              # (max_len, 1)
    div_term = jnp.exp(
        jnp.arange(0, d_model, 2, dtype=jnp.float32) * (-math.log(10000.0) / d_model)
    )                                                                           # (ceil(d/2),)
    angles = position * div_term                                                # (max_len, ceil(d/2))
    pe = jnp.zeros((max_len, d_model), dtype=jnp.float32)
    pe = pe.at[:, 0::2].set(jnp.sin(angles))
    pe = pe.at[:, 1::2].set(jnp.cos(angles[:, : d_model // 2]))  # also handles odd d_model
    return pe.astype(dtype)


def _add_kernel(x_ref, pe_ref, o_ref):
    # Both paths present (rows, 128) tiles to the kernel; plain VPU add.
    o_ref[...] = x_ref[...] + pe_ref[...]


def _cdiv(a: int, b: int) -> int:
    return -(-a // b)


def _round_down(x: int, m: int) -> int:
    return (x // m) * m


def _round_up(x: int, m: int) -> int:
    return _cdiv(x, m) * m


def _sublane_multiple(dtype) -> int:
    # f32 -> 8, bf16 -> 16, int8/fp8 -> 32 (native packed-row tiles).
    return max(8, 32 // jnp.dtype(dtype).itemsize)


def _default_target_block_bytes() -> int:
    """Chip-aware x-tile target (HBM-bound kernel: bigger tiles amortize the
    ~0.35 us per-grid-step overhead; bounded by scoped VMEM)."""
    try:
        kind = jax.devices()[0].device_kind.lower()
    except Exception:  # pragma: no cover - defensive
        return 2 << 20
    if "v7" in kind:
        return 4 << 20      # 3.2 TB/s HBM; 6x working set ~24-28 MiB < 32 MiB scoped, 64 MiB phys
    if "v6" in kind or "trillium" in kind:
        return 4 << 20      # ~1.4 TB/s
    if "v5" in kind and ("lite" in kind or "v5e" in kind):
        return 2 << 20      # v5e scoped default 16 MiB: keep 6x working set under it
    return 2 << 20


def _vmem_limit_bytes(tile_rows: int, itemsize: int, n_bufs: int) -> int:
    # x + out have n_bufs buffers each, pe tile double-buffered, plus slack.
    tile_bytes = tile_rows * _LANE * itemsize
    needed = (2 * n_bufs + 2) * tile_bytes + (4 << 20)
    return int(min(48 << 20, max(32 << 20, needed)))  # 48 MiB safe on all gens (v7x phys = 64)


def positional_encoding(
    x: jnp.ndarray,
    pe_table: jnp.ndarray,
    *,
    target_block_bytes: int | None = None,   # default: chip-aware
    max_block_rows: int | None = None,       # optional cap (testing / tight-VMEM builds)
    buffer_count: int | None = None,         # None -> default double-buffering; 3 -> pl.Buffered(3)
    in_place: bool = False,                  # opt-in: only if the caller donates x
    force_kernel: bool = False,
) -> jnp.ndarray:
    """x: (B, S, D); pe_table: (max_len, D). Returns x + pe_table[:S] (broadcast over B)."""
    B, S, D = x.shape
    max_len, d_model = pe_table.shape
    if D != d_model:
        raise ValueError(f"d_model mismatch: x has {D}, pe table has {d_model}")
    if S > max_len:
        raise ValueError(f"sequence length {S} exceeds pe table max_len {max_len}")

    pe = pe_table[:S, :].astype(x.dtype)  # documented deviation: add in x.dtype, output x.dtype
    itemsize = jnp.dtype(x.dtype).itemsize

    # Non-lane-foldable shapes: a <128-wide last dim would pay masked vst.msk
    # partial stores (the single biggest measured layout penalty); XLA's fused
    # broadcast add is the better tool there.
    if (S * D) % _LANE != 0:
        return x + pe[None, :, :]
    # Tiny inputs: launch + per-step overhead dwarfs the traffic.
    if not force_kernel and B * S * D * itemsize < (256 << 10):
        return x + pe[None, :, :]

    if target_block_bytes is None:
        target_block_bytes = _default_target_block_bytes()

    R = (S * D) // _LANE          # lane-dense fold: (S, D) -> (R, 128)
    C = _LANE
    sm = _sublane_multiple(x.dtype)

    target_rows = max(sm, target_block_bytes // (C * itemsize))
    if max_block_rows is not None:
        target_rows = max(sm, min(target_rows, max_block_rows))

    n_bufs = 2 if buffer_count is None else int(buffer_count)
    pm = {} if buffer_count is None else {"pipeline_mode": pl.Buffered(int(buffer_count))}
    alias_kwargs = {"input_output_aliases": {0: 0}} if in_place else {}

    # Flat (large-batch / short-sequence) path needs blocks that start on a
    # batch boundary AND are sublane-aligned -> block rows must be a multiple of
    # lcm(R, sm).  Only use it when that unit is no bigger than the target tile.
    unit = (R * sm) // math.gcd(R, sm)
    use_flat = (R < target_rows) and (unit <= target_rows)

    if not use_flat:
        # ---- Path A: long sequences. grid = (row_tiles, B), pe tile resident
        # across the inner batch axis (constant block index (r, 0)).
        tr = max(sm, _round_down(min(target_rows, R), sm))
        n_row_tiles = _cdiv(R, tr)
        tr = min(R, _round_up(_cdiv(R, n_row_tiles), sm))   # balance tiles for megacore
        n_row_tiles = _cdiv(R, tr)

        x3 = x.reshape(B, R, C)
        pe2 = pe.reshape(R, C)

        out3 = pl.pallas_call(
            _add_kernel,
            out_shape=jax.ShapeDtypeStruct((B, R, C), x.dtype),
            grid_spec=pltpu.PrefetchScalarGridSpec(
                num_scalar_prefetch=0,
                grid=(n_row_tiles, B),
                in_specs=[
                    pl.BlockSpec((pl.Squeezed(), tr, C), lambda r, b: (b, r, 0), **pm),
                    pl.BlockSpec((tr, C), lambda r, b: (r, 0)),
                ],
                out_specs=pl.BlockSpec((pl.Squeezed(), tr, C), lambda r, b: (b, r, 0), **pm),
            ),
            compiler_params=pltpu.CompilerParams(
                dimension_semantics=("parallel", "parallel"),
                vmem_limit_bytes=_vmem_limit_bytes(tr, itemsize, n_bufs),
            ),
            **alias_kwargs,
        )(x3, pe2)
        return out3.reshape(B, S, D)

    # ---- Path B: short sequences / large batch.  Flatten to (B*R, 128) so
    # tiles are ~target-sized regardless of how small the per-batch slab is.
    total_rows = B * R
    target_rows_u = max(unit, _round_down(target_rows, unit))

    if total_rows <= target_rows_u:
        if total_rows >= 2 * unit:
            # Split into 2 tiles so both v7x TensorCores get work.
            bt = unit * _cdiv(_cdiv(total_rows, 2), unit)
        else:
            bt = total_rows                       # single full-extent block (always legal)
    else:
        n = _cdiv(total_rows, target_rows_u)
        bt = unit * _cdiv(_cdiv(total_rows, n), unit)  # balanced, unit-aligned
    n_tiles = _cdiv(total_rows, bt)
    reps = bt // R                                # bt % R == 0 by construction

    x2 = x.reshape(total_rows, C)
    # One block's worth of pe, pre-tiled in the wrapper (tiny one-off HBM cost);
    # constant block index keeps it resident in VMEM across all grid steps.
    pe_blk = jnp.tile(pe.reshape(R, C), (reps, 1))

    out2 = pl.pallas_call(
        _add_kernel,
        out_shape=jax.ShapeDtypeStruct((total_rows, C), x.dtype),
        grid_spec=pltpu.PrefetchScalarGridSpec(
            num_scalar_prefetch=0,
            grid=(n_tiles,),
            in_specs=[
                pl.BlockSpec((bt, C), lambda i: (i, 0), **pm),
                pl.BlockSpec((bt, C), lambda i: (0, 0)),
            ],
            out_specs=pl.BlockSpec((bt, C), lambda i: (i, 0), **pm),
        ),
        compiler_params=pltpu.CompilerParams(
            dimension_semantics=("parallel",),
            vmem_limit_bytes=_vmem_limit_bytes(bt, itemsize, n_bufs),
        ),
        **alias_kwargs,
    )(x2, pe_blk)
    return out2.reshape(B, S, D)


if __name__ == "__main__":
    key = jax.random.PRNGKey(0)
    k1, k2, k3, k4, k5 = jax.random.split(key, 5)
    MAX_LEN = 512

    # Case 1: module's nominal shape (batch=2, seq=8, d_model=32), f32.
    # S*D=256 -> folded (R=2, C=128); flat path, single full-extent block.
    B1, S1, D1 = 2, 8, 32
    pe1 = _build_pe_table(D1, MAX_LEN)
    x1 = jax.random.normal(k1, (B1, S1, D1), dtype=jnp.float32)
    ref1 = x1 + pe1[None, :S1, :]
    out1 = jax.block_until_ready(positional_encoding(x1, pe1, force_kernel=True))
    assert out1.shape == (B1, S1, D1)
    assert jnp.allclose(out1, ref1, atol=1e-6), "case 1 mismatch vs reference"

    # Case 2: flat path, multi-tile grid with a ragged edge block.
    # R=8, total_rows=40, block=16 rows -> 3 tiles (last partial).
    B2, S2, D2 = 5, 16, 64
    pe2t = _build_pe_table(D2, MAX_LEN)
    x2 = jax.random.normal(k2, (B2, S2, D2), dtype=jnp.float32)
    ref2 = x2 + pe2t[None, :S2, :]
    out2 = jax.block_until_ready(
        positional_encoding(x2, pe2t, force_kernel=True, max_block_rows=16)
    )
    assert jnp.allclose(out2, ref2, atol=1e-6), "case 2 mismatch vs reference"

    # Case 3: long-sequence path (grid = (row_tiles, B), resident pe tile).
    # R=32, 8-row tiles -> grid (4, 2).
    B3, S3, D3 = 2, 64, 64
    pe3t = _build_pe_table(D3, MAX_LEN)
    x3 = jax.random.normal(k3, (B3, S3, D3), dtype=jnp.float32)
    ref3 = x3 + pe3t[None, :S3, :]
    out3 = jax.block_until_ready(
        positional_encoding(x3, pe3t, force_kernel=True, max_block_rows=8)
    )
    assert jnp.allclose(out3, ref3, atol=1e-6), "case 3 mismatch vs reference"

    # Case 4: bf16 (16-row sublane rounding), flat path, 2 tiles.
    B4, S4, D4 = 4, 16, 64
    pe4t = _build_pe_table(D4, MAX_LEN)
    x4 = jax.random.normal(k4, (B4, S4, D4), dtype=jnp.float32).astype(jnp.bfloat16)
    ref4 = x4 + pe4t[None, :S4, :].astype(jnp.bfloat16)
    out4 = jax.block_until_ready(
        positional_encoding(x4, pe4t, force_kernel=True, max_block_rows=16)
    )
    assert out4.dtype == jnp.bfloat16
    assert jnp.allclose(out4.astype(jnp.float32), ref4.astype(jnp.float32), atol=2e-2), \
        "case 4 mismatch vs reference"

    # Case 5: non-lane-foldable D (S*D % 128 != 0) -> XLA fused-add fallback.
    B5, S5, D5 = 2, 24, 40
    pe5t = _build_pe_table(D5, MAX_LEN)
    x5 = jax.random.normal(k5, (B5, S5, D5), dtype=jnp.float32)
    ref5 = x5 + pe5t[None, :S5, :]
    out5 = jax.block_until_ready(positional_encoding(x5, pe5t))
    assert jnp.allclose(out5, ref5, atol=1e-6), "case 5 mismatch vs reference"

    print("KERNEL_OK")
</pallas_src>

<mosaic_0001>
module attributes {stable_mosaic.version = 11 : i64} {
  func.func @_add_kernel(%arg0: i32, %arg1: memref<4x128xf32, #tpu.memory_space<vmem>>, %arg2: memref<4x128xf32, #tpu.memory_space<vmem>>, %arg3: memref<4x128xf32, #tpu.memory_space<vmem>>) attributes {dimension_semantics = [#tpu.dimension_semantics<parallel>], iteration_bounds = array<i64: 1>, scalar_prefetch = 0 : i64, scratch_operands = 0 : i64, tpu.core_type = #tpu.core_type<tc>, window_params = [{transform_indices = @transform_0, window_bounds = array<i64: 4, 128>}, {pipeline_mode = #tpu.pipeline_mode<synchronous>, transform_indices = @transform_1, window_bounds = array<i64: 4, 128>}, {transform_indices = @transform_2, window_bounds = array<i64: 4, 128>}]} {
    %c0 = arith.constant 0 : index
    %c0_0 = arith.constant 0 : index
    %0 = vector.load %arg1[%c0, %c0_0] : memref<4x128xf32, #tpu.memory_space<vmem>>, vector<4x128xf32>
    %c0_1 = arith.constant 0 : index
    %c0_2 = arith.constant 0 : index
    %1 = vector.load %arg2[%c0_1, %c0_2] : memref<4x128xf32, #tpu.memory_space<vmem>>, vector<4x128xf32>
    %2 = arith.addf %0, %1 : vector<4x128xf32>
    %c0_3 = arith.constant 0 : index
    %c0_4 = arith.constant 0 : index
    %3 = vector.load %arg3[%c0_3, %c0_4] : memref<4x128xf32, #tpu.memory_space<vmem>>, vector<4x128xf32>
    tpu.vector_store %arg3[%c0_3, %c0_4], %2 {strides = array<i32>} : memref<4x128xf32, #tpu.memory_space<vmem>>, vector<4x128xf32>,
    return
  }
  func.func @transform_0(%arg0: i32) -> (i32, i32) {
    %c0_i32 = arith.constant 0 : i32
    %c0_i32_0 = arith.constant 0 : i32
    return %arg0, %c0_i32 : i32, i32
  }
  func.func @transform_1(%arg0: i32) -> (i32, i32) {
    %c0_i32 = arith.constant 0 : i32
    %c0_i32_0 = arith.constant 0 : i32
    %c0_i32_1 = arith.constant 0 : i32
    return %c0_i32, %c0_i32_0 : i32, i32
  }
  func.func @transform_2(%arg0: i32) -> (i32, i32) {
    %c0_i32 = arith.constant 0 : i32
    %c0_i32_0 = arith.constant 0 : i32
    return %arg0, %c0_i32 : i32, i32
  }
}

</mosaic_0001>

<bundles_post_ra>
// kernel: tpu_custom_call.1
= control target key start
LH: loop header
LB: loop body
LE: loop exit
PB: predicated region body
PF: predicated region fallthrough
CT: control target
= control target key end

     0   :  { %7 = vsyncpa [#allocation3], 0  ;;  %s185_s0 = inlined_call_operand.hbm [shape: f32[4,128], index: 0, kind: input, shape index: {}]   ;;  %s186_s1 = inlined_call_operand.hbm [shape: f32[4,128], index: 1, kind: input, shape index: {}]   ;;  %s187_s2 = inlined_call_operand.hbm [shape: f32[4,128], index: 2, kind: output, shape index: {}]  }
   0x1   :  { %8 = vsyncpa [#allocation6], 0 }
   0x2   :  { %9 = vsyncpa [#allocation4], 0  ;;  %s131_s9 = smov [#allocation2]   ;;  %s132_s11 = smov [#allocation5]  }
   0x3   :  { %s16_s10 = sshll.u32 %s131_s9, 4  ;;  %s26_s12 = sshll.u32 %s132_s11, 4  ;;  %s17_s10 = int_to_ptr.vmem [resolvable:$true] %s16_s10  ;;  %s27_s12 = int_to_ptr.vmem [resolvable:$true] %s26_s12 }
   0x4   :  { %s59_s15 = scalar_lea.hbm %s185_s0, 64 }
   0x5   :  { %p60_p0 = scmp.ne.s32.totalorder %s185_s0, %s59_s15  ;;  %p63_p1 = scmp.lt.u32.totalorder %s59_s15, %s185_s0 }
   0x7   :  { %p65_p2 = pnand %p63_p1, %p60_p0 }
   0x9   :  { %68 = shalt.err (!%p65_p2)
}
   0xa   :  { %s69_s20 = scalar_lea.vmem %s17_s10, 64  ;;  %p74_p4 = scmp.lt.s32.totalorder %s17_s10, %s17_s10 }
   0xb   :  { %p70_p3 = scmp.ne.s32.totalorder %s17_s10, %s69_s20  ;;  %p75_p5 = scmp.lt.s32.totalorder %s69_s20, %s69_s20 }
   0xd   :  { %p76_p6 = por %p75_p5, %p74_p4 }
   0xf   :  { %p77_p7 = pnand %p76_p6, %p70_p3 }
  0x11   :  { %80 = shalt.err (!%p77_p7)
}
  0x12   :  { %19 = dma.hbm_to_vmem [thread:$0]  %s185_s0, 64, %s17_s10, [#allocation3]  }
  0x13   :  { %s81_s25 = scalar_lea.hbm %s186_s1, 64 }
  0x14   :  { %p82_p8 = scmp.ne.s32.totalorder %s186_s1, %s81_s25  ;;  %p85_p9 = scmp.lt.u32.totalorder %s81_s25, %s186_s1 }
  0x16   :  { %p87_p10 = pnand %p85_p9, %p82_p8 }
  0x18   :  { %90 = shalt.err (!%p87_p10)
}
  0x19   :  { %s91_s30 = scalar_lea.vmem %s27_s12, 64  ;;  %p96_p12 = scmp.lt.s32.totalorder %s27_s12, %s27_s12 }
  0x1a   :  { %p92_p11 = scmp.ne.s32.totalorder %s27_s12, %s91_s30  ;;  %p97_p13 = scmp.lt.s32.totalorder %s91_s30, %s91_s30 }
  0x1c   :  { %p98_p0 = por %p97_p13, %p96_p12 }
  0x1e   :  { %p99_p1 = pnand %p98_p0, %p92_p11 }
  0x20   :  { %102 = shalt.err (!%p99_p1)
}
  0x21   :  { %29 = dma.hbm_to_vmem [thread:$0]  %s186_s1, 64, %s27_s12, [#allocation6]  }
  0x22   :  { %125 = dma.done.wait [#allocation3], 64  }
  0x23   :  { %126 = vsyncadd [#allocation3], 4294967232 }
  0x24   :  { %127 = dma.done.wait [#allocation6], 64  }
  0x25   :  { %128 = vsyncadd [#allocation6], 4294967232  ;;  %s133_s4 = smov [#allocation7]   ;;  %v36_v0 = vld [vmem:[#allocation2] sm:$0xf] }
  0x26   :  { %s46_s5 = sshll.u32 %s133_s4, 4  ;;  %v37_v1 = vld [vmem:[#allocation5] sm:$0xf]  ;;  %s47_s5 = int_to_ptr.vmem [resolvable:$true] %s46_s5 }
  0x27   :  { %v38_v2 = vadd.f32 %v37_v1, %v36_v0  ;;  %s103_s6 = scalar_lea.vmem %s47_s5, 64  ;;  %p108_p3 = scmp.lt.s32.totalorder %s47_s5, %s47_s5 }
  0x28   :  { %p104_p2 = scmp.ne.s32.totalorder %s47_s5, %s103_s6  ;;  %p109_p4 = scmp.lt.s32.totalorder %s103_s6, %s103_s6 }
  0x29   :  { %39 = vst [vmem:[#allocation7] sm:$0xf] %v38_v2 }
  0x2a   :  { %p110_p5 = por %p109_p4, %p108_p3 }
  0x2c   :  { %p111_p6 = pnand %p110_p5, %p104_p2 }
  0x2e   :  { %114 = shalt.err (!%p111_p6)
}
  0x2f   :  { %s115_s8 = scalar_lea.hbm %s187_s2, 64 }
  0x30   :  { %p116_p7 = scmp.ne.s32.totalorder %s187_s2, %s115_s8  ;;  %p119_p8 = scmp.lt.u32.totalorder %s115_s8, %s187_s2 }
  0x32   :  { %p121_p9 = pnand %p119_p8, %p116_p7 }
  0x34   :  { %124 = shalt.err (!%p121_p9)
}
  0x35   :  { %49 = dma.vmem_to_hbm [thread:$0]  %s47_s5, 64, %s187_s2, [#allocation4]  }
  0x36   :  { %129 = dma.done.wait [#allocation4], 64  }
  0x37   :  { %130 = vsyncadd [#allocation4], 4294967232 }
  0x38   :  { %53 = vsyncpa [#allocation3], 1 }
  0x39   :  { %54 = vsyncpa [#allocation6], 1 }
  0x3a   :  { %55 = vsyncpa [#allocation4], 1 }

</bundles_post_ra>
